<compile_context>
chip_gen: v7x
topology: tpu7x:2x2x1
jax: 0.10.0
libtpu: 0.0.40
codegen_flags: <defaults>
</compile_context>

<pallas_src>
import functools

import jax
import jax.numpy as jnp
import numpy as np
from jax.experimental import pallas as pl
from jax.experimental.pallas import tpu as pltpu

IN_FEATURES = 784
HIDDEN = 100
NUM_CLASSES = 10
HID_PAD = 128    # 100 -> 128 lanes (zero pad keeps the math exact)
OUT_PAD = 128    # fc2 computed at 128 lanes; only the first 10 are stored


def _round_up(x: int, m: int) -> int:
    return ((x + m - 1) // m) * m


def mlp_kernel(x_ref, w1_ref, b1_ref, w2_ref, b2_ref, o_ref):
    # x arrives as f32 straight from HBM; cast to bf16 on the VPU (compute has
    # huge slack here), accumulate on the MXU in f32.
    x = x_ref[...].astype(jnp.bfloat16)                                # (tm, 784)
    h = jnp.dot(x, w1_ref[...], preferred_element_type=jnp.float32)    # (tm, 128)
    h = jnp.maximum(h + b1_ref[...], 0.0)
    out = jnp.dot(h.astype(jnp.bfloat16), w2_ref[...],
                  preferred_element_type=jnp.float32)                  # (tm, 128)
    out = out + b2_ref[...]
    # Only the first 10 lanes are real logits; the output block is (tm, 10).
    o_ref[...] = out[:, :NUM_CLASSES].astype(o_ref.dtype)


@functools.partial(jax.jit, static_argnames=("tm",))
def mnist_2nn_forward(x, w1, b1, w2, b2, *, tm=512):
    """x: (B, 1, 28, 28) or (B, 784) float32. w1: (784, 100), b1: (100,),
    w2: (100, 10), b2: (10,). Returns (B, 10) float32 logits."""
    x2d = x.reshape(-1, IN_FEATURES)     # view-style reshape; no pad/cast pass
    B = x2d.shape[0]

    # Batch tile: big tiles amortize the ~0.35us per-step pipeline cost, but
    # keep >= 2 grid steps when B allows so both v7x TensorCores get work.
    tm_eff = min(tm, _round_up((B + 1) // 2, 8))
    if tm_eff >= B:
        tm_eff = B                       # single full-extent block (always legal)
    nb = pl.cdiv(B, tm_eff)

    # Weights / biases are tiny; pad their hidden/output lanes to 128 once.
    # Zero-padded rows/cols contribute nothing, so the math is unchanged.
    w1p = jnp.zeros((IN_FEATURES, HID_PAD), jnp.bfloat16)
    w1p = w1p.at[:, :HIDDEN].set(w1.astype(jnp.bfloat16))
    b1p = jnp.zeros((1, HID_PAD), jnp.float32).at[:, :HIDDEN].set(
        b1.reshape(1, HIDDEN).astype(jnp.float32))
    w2p = jnp.zeros((HID_PAD, OUT_PAD), jnp.bfloat16)
    w2p = w2p.at[:HIDDEN, :NUM_CLASSES].set(w2.astype(jnp.bfloat16))
    b2p = jnp.zeros((1, OUT_PAD), jnp.float32).at[:, :NUM_CLASSES].set(
        b2.reshape(1, NUM_CLASSES).astype(jnp.float32))

    grid_spec = pl.GridSpec(
        grid=(nb,),
        in_specs=[
            pl.BlockSpec((tm_eff, IN_FEATURES), lambda i: (i, 0)),   # x tile (f32)
            pl.BlockSpec((IN_FEATURES, HID_PAD), lambda i: (0, 0)),  # W1 resident
            pl.BlockSpec((1, HID_PAD), lambda i: (0, 0)),            # b1 resident
            pl.BlockSpec((HID_PAD, OUT_PAD), lambda i: (0, 0)),      # W2 resident
            pl.BlockSpec((1, OUT_PAD), lambda i: (0, 0)),            # b2 resident
        ],
        out_specs=pl.BlockSpec((tm_eff, NUM_CLASSES), lambda i: (i, 0)),
    )

    flops = 2 * B * (IN_FEATURES * HID_PAD + HID_PAD * OUT_PAD)
    bytes_accessed = (
        B * IN_FEATURES * 4            # x (f32, read once)
        + IN_FEATURES * HID_PAD * 2    # W1 (bf16)
        + HID_PAD * OUT_PAD * 2        # W2 (bf16)
        + (HID_PAD + OUT_PAD) * 4      # biases (f32)
        + B * NUM_CLASSES * 4          # out (f32, 10 lanes only)
    )

    return pl.pallas_call(
        mlp_kernel,
        out_shape=jax.ShapeDtypeStruct((B, NUM_CLASSES), jnp.float32),
        grid_spec=grid_spec,
        compiler_params=pltpu.CompilerParams(
            dimension_semantics=("parallel",)),
        cost_estimate=pl.CostEstimate(
            flops=flops, transcendentals=0, bytes_accessed=bytes_accessed),
    )(x2d, w1p, b1p, w2p, b2p)


def init_params(key):
    """Deterministic init mimicking PyTorch nn.Linear default U(-1/sqrt(fan_in), +)."""
    k1, k2, k3, k4 = jax.random.split(key, 4)
    bound1 = 1.0 / np.sqrt(784.0)
    bound2 = 1.0 / np.sqrt(100.0)
    w1 = jax.random.uniform(k1, (784, 100), jnp.float32, -bound1, bound1)
    b1 = jax.random.uniform(k2, (100,), jnp.float32, -bound1, bound1)
    w2 = jax.random.uniform(k3, (100, 10), jnp.float32, -bound2, bound2)
    b2 = jax.random.uniform(k4, (10,), jnp.float32, -bound2, bound2)
    return w1, b1, w2, b2


def _reference(x, w1, b1, w2, b2):
    """Pure-JAX reference using the same bf16 quantization of matmul inputs
    (f32 accumulation), so only accumulation-order differences remain."""
    x2d = x.reshape(-1, IN_FEATURES)
    xq = x2d.astype(jnp.bfloat16).astype(jnp.float32)
    w1q = w1.astype(jnp.bfloat16).astype(jnp.float32)
    w2q = w2.astype(jnp.bfloat16).astype(jnp.float32)
    h = jnp.maximum(xq @ w1q + b1, 0.0)
    hq = h.astype(jnp.bfloat16).astype(jnp.float32)
    return hq @ w2q + b2


if __name__ == "__main__":
    key = jax.random.PRNGKey(0)
    k_x, k_x2, k_p = jax.random.split(key, 3)
    w1, b1, w2, b2 = init_params(k_p)

    # Test 1: MNIST-like NCHW input, batch=2 -> view(-1, 784).
    x = jax.random.normal(k_x, (2, 1, 28, 28), jnp.float32)
    out = jax.block_until_ready(mnist_2nn_forward(x, w1, b1, w2, b2))
    ref = _reference(x, w1, b1, w2, b2)
    np.testing.assert_allclose(np.asarray(out), np.asarray(ref),
                               rtol=1e-2, atol=1e-2)
    assert out.shape == (2, 10) and out.dtype == jnp.float32

    # Test 2: ragged batch (B=37) -> multi-step grid with a masked last block.
    x2 = jax.random.normal(k_x2, (37, 784), jnp.float32)
    out2 = jax.block_until_ready(mnist_2nn_forward(x2, w1, b1, w2, b2))
    ref2 = _reference(x2, w1, b1, w2, b2)
    np.testing.assert_allclose(np.asarray(out2), np.asarray(ref2),
                               rtol=1e-2, atol=1e-2)
    assert out2.shape == (37, 10)

    print("KERNEL_OK")
</pallas_src>

<mosaic_0001>
module attributes {stable_mosaic.version = 11 : i64} {
  func.func @mlp_kernel(%arg0: i32, %arg1: memref<2x784xf32, #tpu.memory_space<vmem>>, %arg2: memref<784x128xbf16, #tpu.memory_space<vmem>>, %arg3: memref<1x128xf32, #tpu.memory_space<vmem>>, %arg4: memref<128x128xbf16, #tpu.memory_space<vmem>>, %arg5: memref<1x128xf32, #tpu.memory_space<vmem>>, %arg6: memref<2x10xf32, #tpu.memory_space<vmem>>) attributes {dimension_semantics = [#tpu.dimension_semantics<parallel>], iteration_bounds = array<i64: 1>, scalar_prefetch = 0 : i64, scratch_operands = 0 : i64, tpu.core_type = #tpu.core_type<tc>, window_params = [{transform_indices = @transform_0, window_bounds = array<i64: 2, 784>}, {pipeline_mode = #tpu.pipeline_mode<synchronous>, transform_indices = @transform_1, window_bounds = array<i64: 784, 128>}, {pipeline_mode = #tpu.pipeline_mode<synchronous>, transform_indices = @transform_2, window_bounds = array<i64: 1, 128>}, {pipeline_mode = #tpu.pipeline_mode<synchronous>, transform_indices = @transform_3, window_bounds = array<i64: 128, 128>}, {pipeline_mode = #tpu.pipeline_mode<synchronous>, transform_indices = @transform_4, window_bounds = array<i64: 1, 128>}, {transform_indices = @transform_5, window_bounds = array<i64: 2, 10>}]} {
    %c0 = arith.constant 0 : index
    %c0_0 = arith.constant 0 : index
    %0 = vector.load %arg1[%c0, %c0_0] : memref<2x784xf32, #tpu.memory_space<vmem>>, vector<2x784xf32>
    %1 = arith.truncf %0 : vector<2x784xf32> to vector<2x784xbf16>
    %c0_1 = arith.constant 0 : index
    %c0_2 = arith.constant 0 : index
    %2 = vector.load %arg2[%c0_1, %c0_2] : memref<784x128xbf16, #tpu.memory_space<vmem>>, vector<784x128xbf16>
    %cst = arith.constant dense<0.000000e+00> : vector<2x128xf32>
    %3 = tpu.matmul %1, %2, %cst {dimension_numbers = #tpu.dot_dimension_numbers<[1], [0], [0], [1], [0, 0, 1, 1], [], []>} : vector<2x784xbf16>, vector<784x128xbf16>, vector<2x128xf32> -> vector<2x128xf32>
    %c0_3 = arith.constant 0 : index
    %c0_4 = arith.constant 0 : index
    %4 = vector.load %arg3[%c0_3, %c0_4] : memref<1x128xf32, #tpu.memory_space<vmem>>, vector<1x128xf32>
    %5 = vector.broadcast %4 : vector<1x128xf32> to vector<2x128xf32>
    %6 = arith.addf %3, %5 : vector<2x128xf32>
    %cst_5 = arith.constant 0.000000e+00 : f32
    %7 = vector.broadcast %cst_5 : f32 to vector<2x128xf32>
    %8 = arith.maximumf %6, %7 : vector<2x128xf32>
    %9 = arith.truncf %8 : vector<2x128xf32> to vector<2x128xbf16>
    %c0_6 = arith.constant 0 : index
    %c0_7 = arith.constant 0 : index
    %10 = vector.load %arg4[%c0_6, %c0_7] : memref<128x128xbf16, #tpu.memory_space<vmem>>, vector<128x128xbf16>
    %cst_8 = arith.constant dense<0.000000e+00> : vector<2x128xf32>
    %11 = tpu.matmul %9, %10, %cst_8 {dimension_numbers = #tpu.dot_dimension_numbers<[1], [0], [0], [1], [0, 0, 1, 1], [], []>} : vector<2x128xbf16>, vector<128x128xbf16>, vector<2x128xf32> -> vector<2x128xf32>
    %c0_9 = arith.constant 0 : index
    %c0_10 = arith.constant 0 : index
    %12 = vector.load %arg5[%c0_9, %c0_10] : memref<1x128xf32, #tpu.memory_space<vmem>>, vector<1x128xf32>
    %13 = vector.broadcast %12 : vector<1x128xf32> to vector<2x128xf32>
    %14 = arith.addf %11, %13 : vector<2x128xf32>
    %15 = vector.extract_strided_slice %14 {offsets = [0, 0], sizes = [2, 10], strides = [1, 1]} : vector<2x128xf32> to vector<2x10xf32>
    %c0_11 = arith.constant 0 : index
    %c0_12 = arith.constant 0 : index
    %16 = vector.load %arg6[%c0_11, %c0_12] : memref<2x10xf32, #tpu.memory_space<vmem>>, vector<2x10xf32>
    tpu.vector_store %arg6[%c0_11, %c0_12], %15 {strides = array<i32>} : memref<2x10xf32, #tpu.memory_space<vmem>>, vector<2x10xf32>,
    return
  }
  func.func @transform_0(%arg0: i32) -> (i32, i32) {
    %c0_i32 = arith.constant 0 : i32
    %c0_i32_0 = arith.constant 0 : i32
    return %arg0, %c0_i32 : i32, i32
  }
  func.func @transform_1(%arg0: i32) -> (i32, i32) {
    %c0_i32 = arith.constant 0 : i32
    %c0_i32_0 = arith.constant 0 : i32
    %c0_i32_1 = arith.constant 0 : i32
    return %c0_i32, %c0_i32_0 : i32, i32
  }
  func.func @transform_2(%arg0: i32) -> (i32, i32) {
    %c0_i32 = arith.constant 0 : i32
    %c0_i32_0 = arith.constant 0 : i32
    %c0_i32_1 = arith.constant 0 : i32
    return %c0_i32, %c0_i32_0 : i32, i32
  }
  func.func @transform_3(%arg0: i32) -> (i32, i32) {
    %c0_i32 = arith.constant 0 : i32
    %c0_i32_0 = arith.constant 0 : i32
    %c0_i32_1 = arith.constant 0 : i32
    return %c0_i32, %c0_i32_0 : i32, i32
  }
  func.func @transform_4(%arg0: i32) -> (i32, i32) {
    %c0_i32 = arith.constant 0 : i32
    %c0_i32_0 = arith.constant 0 : i32
    %c0_i32_1 = arith.constant 0 : i32
    return %c0_i32, %c0_i32_0 : i32, i32
  }
  func.func @transform_5(%arg0: i32) -> (i32, i32) {
    %c0_i32 = arith.constant 0 : i32
    %c0_i32_0 = arith.constant 0 : i32
    return %arg0, %c0_i32 : i32, i32
  }
}

</mosaic_0001>

<bundles_post_ra>
// kernel: mnist_2nn_forward.1
= control target key start
LH: loop header
LB: loop body
LE: loop exit
PB: predicated region body
PF: predicated region fallthrough
CT: control target
= control target key end

     0   :  { %v30_v27 = vlaneseq  ;;  %v1015_v35 = vmov 1983009808   ;;  %v1016_v40 = vmov 0.0   ;;  %vm1017_vm0 = vmmov 0   ;;  %s1258_s0 = inlined_call_operand.vmem [shape: f32[2,784], index: 0, kind: input, shape index: {}]   ;;  %s1259_s1 = inlined_call_operand.vmem [shape: bf16[784,128], index: 1, kind: input, shape index: {}]   ;;  %s1260_s2 = inlined_call_operand.vmem [shape: f32[1,128], index: 2, kind: input, shape index: {}]   ;;  %s1261_s3 = inlined_call_operand.vmem [shape: bf16[128,128], index: 3, kind: input, shape index: {}]   ;;  %s1262_s4 = inlined_call_operand.vmem [shape: f32[1,128], index: 4, kind: input, shape index: {}]   ;;  %s1263_s5 = inlined_call_operand.hbm [shape: f32[2,10], index: 5, kind: output, shape index: {}]  }
   0x1   :  { %v932_v0 = vld [vmem:[%s1259_s1 + $0x40] sm:$0xff]   ;;  %v936_v4 = vld [vmem:[%s1259_s1 + $0x48] sm:$0xff]   ;;  %v940_v8 = vld [vmem:[%s1259_s1 + $0x50] sm:$0xff]   ;;  %v28_v36 = vunpack.c.l.s4 %v1015_v35  ;;  %vm472_vm1 = vcmask 130048  }
   0x2   :  { %v933_v1 = vld [vmem:[%s1259_s1] sm:$0xff]   ;;  %825 = vmatprep.subr.bf16.mxu0 %v932_v0  ;;  %v937_v5 = vld [vmem:[%s1259_s1 + $0x8] sm:$0xff]   ;;  %v941_v9 = vld [vmem:[%s1259_s1 + $0x10] sm:$0xff]   ;;  %v31_v32 = vshrl.u32 %v30_v27, 7 }
   0x3   :  { %v934_v2 = vld [vmem:[%s1259_s1 + $0xc0] sm:$0xff]   ;;  %826 = vmatpush3.bf16.msra.mxu0 %v933_v1  ;;  %v938_v6 = vld [vmem:[%s1259_s1 + $0xc8] sm:$0xff]   ;;  %v942_v10 = vld [vmem:[%s1259_s1 + $0xd0] sm:$0xff]   ;;  %v29_v38 = vunpack.c.0.s8 %v28_v36 }
   0x4   :  { %v935_v3 = vld [vmem:[%s1259_s1 + $0x80] sm:$0xff]   ;;  %847 = vmatprep.subr.bf16.mxu1 %v934_v2  ;;  %827 = vmatprep.subr.bf16.mxu0 %v936_v4  ;;  %v939_v7 = vld [vmem:[%s1259_s1 + $0x88] sm:$0xff]   ;;  %v943_v11 = vld [vmem:[%s1259_s1 + $0x90] sm:$0xff]  }
   0x5   :  { %848 = vmatpush3.bf16.msra.mxu1 %v935_v3  ;;  %v944_v12 = vld [vmem:[%s1259_s1 + $0x58] sm:$0xff]   ;;  %v948_v16 = vld [vmem:[%s1259_s1 + $0x60] sm:$0xff]   ;;  %v952_v20 = vld [vmem:[%s1259_s1 + $0x68] sm:$0xff]   ;;  %v32_v41 = vsub.s32 %v29_v38, %v31_v32 }
   0x6   :  { %849 = vmatprep.subr.bf16.mxu1 %v938_v6  ;;  %v945_v13 = vld [vmem:[%s1259_s1 + $0x18] sm:$0xff]   ;;  %v949_v17 = vld [vmem:[%s1259_s1 + $0x20] sm:$0xff]   ;;  %v953_v21 = vld [vmem:[%s1259_s1 + $0x28] sm:$0xff]  }
   0x7   :  { %828 = vmatpush3.bf16.msra.mxu0 %v937_v5  ;;  %v946_v14 = vld [vmem:[%s1259_s1 + $0xd8] sm:$0xff]   ;;  %v950_v18 = vld [vmem:[%s1259_s1 + $0xe0] sm:$0xff]   ;;  %v954_v22 = vld [vmem:[%s1259_s1 + $0xe8] sm:$0xff]  }
   0x8   :  { %829 = vmatprep.subr.bf16.mxu0 %v940_v8  ;;  %v947_v15 = vld [vmem:[%s1259_s1 + $0x98] sm:$0xff]   ;;  %v951_v19 = vld [vmem:[%s1259_s1 + $0xa0] sm:$0xff]   ;;  %v955_v23 = vld [vmem:[%s1259_s1 + $0xa8] sm:$0xff]  }
   0x9   :  { %850 = vmatpush3.bf16.msra.mxu1 %v939_v7  ;;  %v956_v24 = vld [vmem:[%s1259_s1 + $0x70] sm:$0xff]   ;;  %v960_v29 = vld [vmem:[%s1259_s1 + $0x78] sm:$0xff]   ;;  %v22_v33 = vld [vmem:[%s1258_s0] sm:$0xff] }
   0xa   :  { %851 = vmatprep.subr.bf16.mxu1 %v942_v10  ;;  %v957_v25 = vld [vmem:[%s1259_s1 + $0x30] sm:$0xff]   ;;  %v961_v30 = vld [vmem:[%s1259_s1 + $0x38] sm:$0xff]   ;;  %v964_v37 = vld [vmem:[%s1259_s1 + $0x140] sm:$0xff]   ;;  %v26_v39 = vcombine.high %v22_v33, %v22_v33  ;;  %v33_v42 = vrot.slane %v22_v33, %v32_v41 }
   0xb   :  { %830 = vmatpush3.bf16.msra.mxu0 %v941_v9  ;;  %v958_v26 = vld [vmem:[%s1259_s1 + $0xf0] sm:$0xff]   ;;  %v962_v31 = vld [vmem:[%s1259_s1 + $0xf8] sm:$0xff]   ;;  %v966_v50 = vld [vmem:[%s1259_s1 + $0x100] sm:$0xff]  }
   0xc   :  { %831 = vmatprep.subr.bf16.mxu0 %v944_v12  ;;  %v959_v28 = vld [vmem:[%s1259_s1 + $0xb0] sm:$0xff]   ;;  %v963_v34 = vld [vmem:[%s1259_s1 + $0xb8] sm:$0xff]   ;;  %v40_v43 = vrot.slane %v26_v39, %v32_v41  ;;  %v41_v44 = vcombine.high %v33_v42, %v33_v42  ;;  %v66_v46 = vpack.c.bf16 %v33_v42, %v33_v42  ;;  %v967_v51 = vld [vmem:[%s1259_s1 + $0x148] sm:$0xff]  }
   0xd   :  { %852 = vmatpush3.bf16.msra.mxu1 %v943_v11  ;;  %v968_v52 = vld [vmem:[%s1259_s1 + $0x108] sm:$0xff]   ;;  %v969_v53 = vld [vmem:[%s1259_s1 + $0x150] sm:$0xff]   ;;  %v971_v55 = vld [vmem:[%s1259_s1 + $0x158] sm:$0xff]  }
   0xe   :  { %853 = vmatprep.subr.bf16.mxu1 %v946_v14  ;;  %v42_v45 = vcombine.high %v40_v43, %v40_v43  ;;  %v68_v47 = vpack.c.bf16 %v40_v43, %v40_v43  ;;  %v67_v48 = vpack.c.bf16 %v41_v44, %v41_v44  ;;  %v970_v54 = vld [vmem:[%s1259_s1 + $0x110] sm:$0xff]   ;;  %v981_v56 = vld [vmem:[%s1259_s1 + $0x180] sm:$0xff]   ;;  %v23_v57 = vld [vmem:[%s1258_s0 + $0x8] sm:$0x3f] }
   0xf   :  { %832 = vmatpush3.bf16.msra.mxu0 %v945_v13  ;;  %v43_v58 = vcombine.high %v23_v57, %v23_v57  ;;  %v50_v59 = vrot.slane %v23_v57, %v32_v41  ;;  %v972_v60 = vld [vmem:[%s1259_s1 + $0x118] sm:$0xff]   ;;  %v973_v1 = vld [vmem:[%s1259_s1 + $0x160] sm:$0xff]  }
  0x10   :  { %833 = vmatprep.subr.bf16.mxu0 %v948_v16  ;;  %v69_v49 = vpack.c.bf16 %v42_v45, %v42_v45  ;;  %508 = vmatprep.mubr.bf16.mxu0 %v67_v48 }
  0x11   :  { %854 = vmatpush3.bf16.msra.mxu1 %v947_v15  ;;  %v57_v61 = vrot.slane %v43_v58, %v32_v41  ;;  %v58_v62 = vcombine.high %v50_v59, %v50_v59 }
  0x12   :  { %855 = vmatprep.subr.bf16.mxu1 %v950_v18  ;;  %548 = vmatprep.mubr.bf16.mxu1 %v69_v49 }
  0x13   :  { %834 = vmatpush3.bf16.msra.mxu0 %v949_v17  ;;  %v71_v63 = vpack.c.bf16 %v58_v62, %v58_v62  ;;  %v72_v0 = vpack.c.bf16 %v57_v61, %v57_v61 }
  0x14   :  { %835 = vmatprep.subr.bf16.mxu0 %v952_v20 }
  0x15   :  { %856 = vmatpush3.bf16.msra.mxu1 %v951_v19 }
  0x16   :  { %857 = vmatprep.subr.bf16.mxu1 %v954_v22 }
  0x17   :  { %836 = vmatpush3.bf16.msra.mxu0 %v953_v21 }
  0x18   :  { %837 = vmatprep.subr.bf16.mxu0 %v956_v24 }
  0x19   :  { %858 = vmatpush3.bf16.msra.mxu1 %v955_v23 }
  0x1a   :  { %859 = vmatprep.subr.bf16.mxu1 %v958_v26 }
  0x1b   :  { %838 = vmatpush3.bf16.msra.mxu0 %v957_v25 }
  0x1c   :  { %839 = vmatprep.subr.bf16.mxu0 %v960_v29 }
  0x1d   :  { %860 = vmatpush3.bf16.msra.mxu1 %v959_v28 }
  0x1e   :  { %861 = vmatprep.subr.bf16.mxu1 %v962_v31 }
  0x1f   :  { %840 = vmatpush3.bf16.msra.mxu0 %v961_v30 }
  0x20   :  { %869 = vmatprep.subr.bf16.mxu0 %v964_v37 }
  0x21   :  { %862 = vmatpush3.bf16.msra.mxu1 %v963_v34 }
  0x22   :  { %902 = vmatprep.subr.bf16.mxu1 %v1016_v40  ;;  %509 = vmatmul.mubr.bf16.vlgmr.msra.gmra.mrb[0].mxu0 %v66_v46 }
  0x23   :  { %870 = vmatpush3.bf16.msra.mxu0 %v966_v50 }
  0x24   :  { %549 = vmatmul.mubr.bf16.vlgmr.msra.gmra.mrb[0].mxu1 %v68_v47  ;;  %871 = vmatprep.subr.bf16.mxu0 %v967_v51 }
  0x25   :  { %904 = vmatprep.mubr.msk.bf16.mxu1 %vm1017_vm0, %v1016_v40  ;;  %903 = vmatpush3.bf16.msra.mxu1 %v981_v56 }
  0x26   :  { %908 = vmatprep.subr.bf16.mxu1 %v1016_v40 }
  0x27   :  { %872 = vmatpush3.bf16.msra.mxu0 %v968_v52 }
  0x28   :  { %873 = vmatprep.subr.bf16.mxu0 %v969_v53 }
  0x2b   :  { %874 = vmatpush3.bf16.msra.mxu0 %v970_v54 }
  0x2c   :  { %875 = vmatprep.subr.bf16.mxu0 %v971_v55 }
  0x2d   :  { %10 = vsyncpa [#allocation3], 0  ;;  %588 = vmatprep.mubr.bf16.mxu0 %v71_v63  ;;  %905 = vmatmul.mubr.msk.bf16.vlgmr.msra.gmra.mrb[4].mxu1 %vm472_vm1, %v72_v0  ;;  %v974_v2 = vld [vmem:[%s1259_s1 + $0x120] sm:$0xff]   ;;  %v975_v3 = vld [vmem:[%s1259_s1 + $0x168] sm:$0xff]   ;;  %v70_v9 = vpack.c.bf16 %v50_v59, %v50_v59  ;;  %s1018_s10 = smov [#allocation2]   ;;  %vm749_vm2 = vcmask 74752  }
  0x2e   :  { %924 = vmatprep.mubr.msk.bf16.mxu1 %vm1017_vm0, %v1016_v40  ;;  %v976_v4 = vld [vmem:[%s1259_s1 + $0x128] sm:$0xff]   ;;  %v977_v5 = vld [vmem:[%s1259_s1 + $0x170] sm:$0xff]   ;;  %v979_v7 = vld [vmem:[%s1259_s1 + $0x178] sm:$0xff]   ;;  %s757_s11 = sshll.u32 %s1018_s10, 4  ;;  %s758_s11 = int_to_ptr.vmem [resolvable:$true] %s757_s11 }
  0x2f   :  { %876 = vmatpush3.bf16.msra.mxu0 %v972_v60  ;;  %v978_v6 = vld [vmem:[%s1259_s1 + $0x130] sm:$0xff]   ;;  %v980_v8 = vld [vmem:[%s1259_s1 + $0x138] sm:$0xff]   ;;  %v983_v10 = vld [vmem:[%s1261_s3] sm:$0xff]   ;;  %s991_s12 = scalar_lea.vmem %s758_s11, 32  ;;  %p996_p1 = scmp.lt.s32.totalorder %s758_s11, %s758_s11 }
  0x30   :  { %877 = vmatprep.subr.bf16.mxu0 %v973_v1  ;;  %909 = vmatpush3.bf16.msra.mxu1 %v983_v10  ;;  %v984_v11 = vld [vmem:[%s1261_s3 + $0x8] sm:$0xff]   ;;  %v985_v12 = vld [vmem:[%s1261_s3 + $0x10] sm:$0xff]   ;;  %v986_v13 = vld [vmem:[%s1261_s3 + $0x18] sm:$0xff]   ;;  %p992_p0 = scmp.ne.s32.totalorder %s758_s11, %s991_s12  ;;  %p997_p2 = scmp.lt.s32.totalorder %s991_s12, %s991_s12 }
  0x31   :  { %910 = vmatprep.subr.bf16.mxu1 %v1016_v40  ;;  %v987_v14 = vld [vmem:[%s1261_s3 + $0x20] sm:$0xff]   ;;  %v988_v15 = vld [vmem:[%s1261_s3 + $0x28] sm:$0xff]   ;;  %v989_v16 = vld [vmem:[%s1261_s3 + $0x30] sm:$0xff]  }
  0x32   :  { %v990_v17 = vld [vmem:[%s1261_s3 + $0x38] sm:$0xff]   ;;  %v765_v20 = vld [vmem:[%s1260_s2] ss:$0 sm:$0xff]  ;;  %p998_p3 = por %p997_p2, %p996_p1 }
  0x33   :  { %878 = vmatpush3.bf16.msra.mxu0 %v974_v2  ;;  %v816_v44 = vld [vmem:[%s1262_s4] ss:$0 sm:$0xff] }
  0x34   :  { %879 = vmatprep.subr.bf16.mxu0 %v975_v3  ;;  %911 = vmatpush3.bf16.msra.mxu1 %v984_v11  ;;  %p999_p4 = pnand %p998_p3, %p992_p0 }
  0x35   :  { %912 = vmatprep.subr.bf16.mxu1 %v1016_v40 }
  0x37   :  { %880 = vmatpush3.bf16.msra.mxu0 %v976_v4 }
  0x38   :  { %881 = vmatprep.subr.bf16.mxu0 %v977_v5  ;;  %913 = vmatpush3.bf16.msra.mxu1 %v985_v12 }
  0x39   :  { %914 = vmatprep.subr.bf16.mxu1 %v1016_v40 }
  0x3b   :  { %882 = vmatpush3.bf16.msra.mxu0 %v978_v6 }
  0x3c   :  { %883 = vmatprep.subr.bf16.mxu0 %v979_v7  ;;  %915 = vmatpush3.bf16.msra.mxu1 %v986_v13 }
  0x3d   :  { %916 = vmatprep.subr.bf16.mxu1 %v1016_v40 }
  0x3f   :  { %884 = vmatpush3.bf16.msra.mxu0 %v980_v8 }
  0x40   :  { %917 = vmatpush3.bf16.msra.mxu1 %v987_v14 }
  0x41   :  { %918 = vmatprep.subr.bf16.mxu1 %v1016_v40 }
  0x42   :  { %589 = vmatmul.mubr.bf16.vlgmr.msra.gmra.mrb[4].mxu0 %v70_v9 }
  0x44   :  { %919 = vmatpush3.bf16.msra.mxu1 %v988_v15 }
  0x45   :  { %920 = vmatprep.subr.bf16.mxu1 %v1016_v40 }
  0x48   :  { %921 = vmatpush3.bf16.msra.mxu1 %v989_v16 }
  0x49   :  { %922 = vmatprep.subr.bf16.mxu1 %v1016_v40 }
  0x4c   :  { %923 = vmatpush3.bf16.msra.mxu1 %v990_v17 }
  0xf5   :  { %v841_v18 = vpop.f32.mrb[0].mxu0 }
  0xf6   :  { %v842_v21 = vpop.f32.mrb[1].mxu0 }
  0xf7   :  { %v863_v19 = vpop.f32.mrb[0].mxu1  ;;  %v843_v23 = vadd.f32 %v842_v21, %v841_v18  ;;  %v844_v24 = vpop.f32.mrb[2].mxu0 }
  0xf8   :  { %v864_v22 = vpop.f32.mrb[1].mxu1  ;;  %v845_v27 = vpop.f32.mrb[3].mxu0 }
  0xf9   :  { %v865_v25 = vadd.f32 %v864_v22, %v863_v19  ;;  %v866_v26 = vpop.f32.mrb[2].mxu1  ;;  %v511_v29 = vadd.f32 %v843_v23, %v765_v20 }
  0xfa   :  { %v867_v28 = vpop.f32.mrb[3].mxu1 }
  0xfb   :  { %v551_v30 = vadd.f32 %v865_v25, %v511_v29 }
 0x100   :  { %v630_v31 = vpop.f32.mrb[4].mxu1 }
 0x101   :  { %v906_v32 = vpop.f32.mrb[5].mxu1 }
 0x102   :  { %v633_v33 = vpop.f32.mrb[6].mxu1 }
 0x103   :  { %v907_v34 = vpop.f32.mrb[7].mxu1 }
 0x115   :  { %v885_v35 = vpop.f32.mrb[4].mxu0 }
 0x116   :  { %v886_v36 = vpop.f32.mrb[5].mxu0 }
 0x117   :  { %v887_v37 = vadd.f32 %v886_v36, %v885_v35  ;;  %v888_v38 = vpop.f32.mrb[6].mxu0 }
 0x118   :  { %v889_v39 = vpop.f32.mrb[7].mxu0 }
 0x119   :  { %v591_v40 = vadd.f32 %v887_v37, %v551_v30 }
 0x11b   :  { %v631_v41 = vadd.f32 %v630_v31, %v591_v40 }
 0x11d   :  { %v636_v42 = vmax.f32 %v631_v41, 0.0 }
 0x11f   :  { %v637_v43 = vpack.c.bf16 %v636_v42, %v636_v42 }
 0x121   :  { %925 = vmatmul.mubr.bf16.vlgmr.msra.gmra.mrb[8].mxu1 %v637_v43 }
 0x1f4   :  { %v743_v45 = vpop.f32.mrb[8].mxu1 }
 0x1f5   :  { %v744_v46 = vadd.f32 %v816_v44, %v743_v45  ;;  %v926_v47 = vpop.f32.mrb[9].mxu1 }
 0x1f6   :  { %v746_v48 = vpop.f32.mrb[10].mxu1 }
 0x1f7   :  { %v927_v49 = vpop.f32.mrb[11].mxu1  ;;  %750 = vst.msk [vmem:[#allocation2] sm:$0x3] %vm749_vm2, %v744_v46 }
 0x1f8   :  { %1002 = shalt.err (!%p999_p4)
}
 0x1f9   :  { %s1003_s4 = scalar_lea.hbm %s1263_s5, 32 }
 0x1fa   :  { %p1004_p5 = scmp.ne.s32.totalorder %s1263_s5, %s1003_s4  ;;  %p1007_p6 = scmp.lt.u32.totalorder %s1003_s4, %s1263_s5 }
 0x1fc   :  { %p1009_p7 = pnand %p1007_p6, %p1004_p5 }
 0x1fe   :  { %1012 = shalt.err (!%p1009_p7)
}
 0x1ff   :  { %760 = dma.vmem_to_hbm [thread:$0]  %s758_s11, 32, %s1263_s5, [#allocation3]  }
 0x200   :  { %1013 = dma.done.wait [#allocation3], 32  }
 0x201   :  { %1014 = vsyncadd [#allocation3], 4294967264 }
 0x202   :  { %764 = vsyncpa [#allocation3], 1 }

</bundles_post_ra>
